<compile_context>
chip_gen: v5e
topology: v5e:2x2
jax: 0.10.0
libtpu: 0.0.40
codegen_flags: <defaults>
</compile_context>

<pallas_src>
import copy
from collections import namedtuple

import numpy as np
import jax
import jax.numpy as jnp
from jax.experimental import pallas as pl

Term = namedtuple("Term", ["id2term", "term2id", "id2label"])


def spanner_head_kernel(masks_ref, emb_ref, labels_ref, valid_ref, w_ref, b_ref,
                        rep_ref, preds_ref, stats_ref):
    masks = masks_ref[...]                       # [B, NS, S] bf16 (exact 0/1)
    emb = emb_ref[...]                           # [B, S, H]  bf16
    B, NS, _ = masks.shape
    H = emb.shape[-1]
    Lp = w_ref.shape[-1]                         # lane-padded label count (128)

    # span representation: mask-weighted sum of token embeddings (batched MXU)
    rep = jnp.einsum("bns,bsh->bnh", masks, emb,
                     preferred_element_type=jnp.float32)              # [B, NS, H] f32
    rep_ref[...] = rep.astype(rep_ref.dtype)

    # classification head over all B*NS spans in one MXU pass
    flat = rep.reshape(B * NS, H).astype(jnp.bfloat16)                # safe reshape (lane dim kept)
    logits = jnp.dot(flat, w_ref[...],
                     preferred_element_type=jnp.float32) + b_ref[...]  # [B*NS, Lp]
    logits = logits.reshape(B, NS, Lp)

    ids = jax.lax.broadcasted_iota(jnp.int32, (B, NS, Lp), 2)
    m = jnp.max(logits, axis=-1, keepdims=True)                       # [B, NS, 1]
    # first-occurrence argmax (padded columns carry a -1e30 bias, never win)
    preds_ref[...] = jnp.min(jnp.where(logits >= m, ids, Lp), axis=-1)  # [B, NS] int32

    # masked cross-entropy partial sums (stand-in for NERJointModel's ner_loss)
    labels = labels_ref[...]                                          # [B, NS] int32
    valid = valid_ref[...]                                            # [B, NS] f32
    lse = m + jnp.log(jnp.sum(jnp.exp(logits - m), axis=-1, keepdims=True))
    onehot = (ids == labels[:, :, None]).astype(jnp.float32)          # [B, NS, Lp]
    logp_true = jnp.sum(onehot * (logits - lse), axis=-1)             # [B, NS]
    loss_sum = jnp.sum(-logp_true * valid)
    n_valid = jnp.sum(valid)

    # pack the two scalars into one lane-dense (1, 128) slab (no (B,1,1) outputs)
    lane = jax.lax.broadcasted_iota(jnp.int32, stats_ref.shape, 1)
    stats_ref[...] = (jnp.where(lane == 0, loss_sum, 0.0) +
                      jnp.where(lane == 1, n_valid, 0.0))


@jax.jit
def _ner_forward(tokens, entity_masks, span_labels, span_valid,
                 emb_table, w_pad, b_pad):
    # TODO(synk): pretrained BERT encoder (NERJointModel.from_pretrained) has no
    # in-script equivalent; replaced by a deterministic embedding lookup (glue).
    emb = emb_table[tokens].astype(jnp.bfloat16)           # [B, S, H]
    masks = entity_masks.astype(jnp.bfloat16)              # [B, NS, S], exact 0/1
    labels = span_labels.astype(jnp.int32)                 # [B, NS]  (lane-dense)
    valid = span_valid.astype(jnp.float32)                 # [B, NS]  (lane-dense)

    B, NS, _ = masks.shape
    H = emb.shape[-1]

    rep, preds, stats = pl.pallas_call(
        spanner_head_kernel,
        out_shape=(
            jax.ShapeDtypeStruct((B, NS, H), jnp.float32),   # span embeddings
            jax.ShapeDtypeStruct((B, NS), jnp.int32),        # per-span argmax
            jax.ShapeDtypeStruct((1, 128), jnp.float32),     # [loss_sum, n_valid, 0...]
        ),
    )(masks, emb, labels, valid, w_pad, b_pad)

    ner_loss = stats[0, 0] / jnp.maximum(stats[0, 1], 1.0)

    # sentence_sections = span_masks.sum(-1).cumsum(-1): a B-length integer
    # cumsum -> plain JAX (a dedicated Pallas call here was pure launch overhead).
    # TODO(synk): assumes the torch `span_masks` is the per-span validity mask.
    sections = jnp.cumsum(jnp.sum(valid.astype(jnp.int32), axis=-1))
    return rep, preds, ner_loss, sections


class SpanNERPallas:
    """Pallas re-implementation of SpanNER.forward (train path)."""

    def __init__(self, params, H, L, vocab, key):
        self.params = params
        self.entity_id = 1
        self.num_labels = L
        k1, k2, k3 = jax.random.split(key, 3)
        self.emb_table = jax.random.normal(k1, (vocab, H), jnp.float32) * 0.1
        W = jax.random.normal(k2, (H, L), jnp.float32) * 0.1
        b = jax.random.normal(k3, (1, L), jnp.float32) * 0.01
        # Pad the classifier once to a full 128-lane width: zero weights and a
        # -1e30 bias on padded columns so they never affect softmax / argmax.
        Lp = max(128, ((L + 127) // 128) * 128)
        self.W = jnp.zeros((H, Lp), jnp.float32).at[:, :L].set(W).astype(jnp.bfloat16)
        self.b = jnp.full((1, Lp), -1e30, jnp.float32).at[:, :L].set(b)

    def _ner_layer(self, tokens, entity_masks, span_labels, span_valid):
        return _ner_forward(tokens, entity_masks, span_labels, span_valid,
                            self.emb_table, self.W, self.b)

    def _calculate_loss_syn(self, ner_loss, reco_loss, reco_kld, gen_loss, gen_kld,
                            n_epoch, kl_w):
        results_loss = {'ner_loss': 0.0, 'reco_loss': 0.0, 'kld_reco': 0.0,
                        'gen_loss': 0.0, 'kld_gen': 0.0}
        results_loss['ner_loss'] = float(ner_loss)
        reco_loss_org = reco_loss + kl_w * reco_kld
        gen_loss_org = gen_loss + kl_w * gen_kld
        if self.params['span_reco']:
            results_loss['reco_loss'] = float(reco_loss_org)
            results_loss['kld_reco'] = float(kl_w * reco_kld)
        if self.params['syn_gen'] or self.params['span_syn']:
            results_loss['gen_loss'] = float(gen_loss_org)
            results_loss['kld_gen'] = float(kl_w * gen_kld)
        if self.params['ner_vae_joint']:
            if reco_loss_org != 0 and gen_loss_org != 0:
                total_loss = reco_loss_org + gen_loss_org
            elif reco_loss_org != 0:
                total_loss = reco_loss_org
            else:
                total_loss = gen_loss_org
            total_loss = self.params['gama'] * total_loss
            if n_epoch >= self.params['ner_start_epoch']:
                total_loss = ner_loss + total_loss
        else:
            total_loss = ner_loss
        return total_loss, results_loss

    def forward(self, batch_input, epoch=0, kl_w=0.0, stage='train'):
        (nn_bert_tokens, nn_span_indices, nn_span_labels,
         nn_entity_masks, span_valid, span_terms) = batch_input

        span_emb, preds, ner_loss, sections = self._ner_layer(
            nn_bert_tokens, nn_entity_masks, nn_span_labels, span_valid)

        # VAE branches disabled in this synthetic config -> zero scalar stand-ins
        total_loss, detailed_loss = self._calculate_loss_syn(
            ner_loss, 0.0, 0.0, 0.0, 0.0, epoch, kl_w)

        ner_preds = {}
        ner_preds['gold_terms'] = copy.deepcopy(span_terms)
        ner_preds['span_indices'] = nn_span_indices
        ner_preds['latent_z'] = None
        ner_preds['labels_z'] = []
        ner_preds['vib_z'] = None
        ner_preds['vib_emb'] = None
        ner_preds['latent_z_syn'] = None
        ner_preds['gold_embs'] = span_emb        # stand-in for outputs['span_emb']

        if stage == 'pretrain' or stage == 'test_syn':
            return total_loss, detailed_loss, ner_preds

        # host-side post-processing, identical in spirit to the torch code
        B, NS = nn_span_labels.shape
        preds_np = np.asarray(preds).reshape(B, NS)
        valid_np = np.asarray(span_valid).astype(bool)
        e_preds_flat = preds_np[valid_np].astype(int)          # flat over valid spans
        sentence_sections = np.asarray(sections).reshape(-1).astype(int)
        e_preds = np.split(e_preds_flat, sentence_sections)
        e_preds = [p.flatten() for p in e_preds]
        ner_preds['preds'] = e_preds

        entity_idx = self.entity_id
        out_terms = []
        for span_preds in e_preds:
            doc_spans = Term({}, {}, {})
            for pred_idx, label_id in enumerate(span_preds):
                if label_id > 0:
                    term = 'T' + str(entity_idx)
                    doc_spans.id2term[pred_idx] = term
                    doc_spans.term2id[term] = pred_idx
                    entity_idx += 1
            out_terms.append(doc_spans)
        self.entity_id = entity_idx
        ner_preds['terms'] = out_terms
        return total_loss, detailed_loss, ner_preds


if __name__ == "__main__":
    B, S, NS, H, L, VOCAB = 2, 32, 32, 128, 8, 64

    key = jax.random.PRNGKey(0)
    k_tok, k_start, k_len, k_lab, k_val, k_model = jax.random.split(key, 6)

    tokens = jax.random.randint(k_tok, (B, S), 0, VOCAB, dtype=jnp.int32)

    starts = jax.random.randint(k_start, (B, NS), 0, S - 3, dtype=jnp.int32)
    lengths = jax.random.randint(k_len, (B, NS), 1, 4, dtype=jnp.int32)
    ends = jnp.minimum(starts + lengths, S)
    tok_pos = jnp.arange(S)
    entity_masks = ((tok_pos[None, None, :] >= starts[..., None]) &
                    (tok_pos[None, None, :] < ends[..., None])).astype(jnp.float32)
    span_indices = jnp.stack([starts, ends - 1], axis=-1)

    span_labels = jax.random.randint(k_lab, (B, NS), 0, L, dtype=jnp.int32)
    span_valid = (jax.random.uniform(k_val, (B, NS)) < 0.8).astype(jnp.float32)

    params = {
        'span_reco': False, 'syn_gen': False, 'span_syn': False,
        'ner_vae_joint': False, 'predict': False,
        'gama': 1.0, 'ner_start_epoch': 0,
    }

    model = SpanNERPallas(params, H=H, L=L, vocab=VOCAB, key=k_model)

    gold_terms = [Term({}, {}, {}) for _ in range(B)]
    batch_input = (tokens, span_indices, span_labels, entity_masks,
                   span_valid, gold_terms)

    total_loss, detailed_loss, ner_preds = model.forward(batch_input, epoch=0,
                                                         kl_w=0.0, stage='train')
    jax.block_until_ready(total_loss)
    jax.block_until_ready(ner_preds['gold_embs'])
    print("KERNEL_OK")
</pallas_src>

<mosaic_0001>
module attributes {stable_mosaic.version = 11 : i64} {
  func.func @spanner_head_kernel(%arg0: memref<2x32x32xbf16, #tpu.memory_space<vmem>>, %arg1: memref<2x32x128xbf16, #tpu.memory_space<vmem>>, %arg2: memref<2x32xi32, #tpu.memory_space<vmem>>, %arg3: memref<2x32xf32, #tpu.memory_space<vmem>>, %arg4: memref<128x128xbf16, #tpu.memory_space<vmem>>, %arg5: memref<1x128xf32, #tpu.memory_space<vmem>>, %arg6: memref<2x32x128xf32, #tpu.memory_space<vmem>>, %arg7: memref<2x32xi32, #tpu.memory_space<vmem>>, %arg8: memref<1x128xf32, #tpu.memory_space<vmem>>) attributes {dimension_semantics = [], scalar_prefetch = 0 : i64, scratch_operands = 0 : i64, tpu.core_type = #tpu.core_type<tc>} {
    %c0 = arith.constant 0 : index
    %c0_0 = arith.constant 0 : index
    %c0_1 = arith.constant 0 : index
    %0 = vector.load %arg0[%c0, %c0_0, %c0_1] : memref<2x32x32xbf16, #tpu.memory_space<vmem>>, vector<2x32x32xbf16>
    %c0_2 = arith.constant 0 : index
    %c0_3 = arith.constant 0 : index
    %c0_4 = arith.constant 0 : index
    %1 = vector.load %arg1[%c0_2, %c0_3, %c0_4] : memref<2x32x128xbf16, #tpu.memory_space<vmem>>, vector<2x32x128xbf16>
    "tpu.trace_start"() <{level = 10 : i32, message = "bns,bsh->bnh"}> : () -> ()
    %cst = arith.constant dense<0.000000e+00> : vector<2x32x128xf32>
    %2 = tpu.matmul %0, %1, %cst {dimension_numbers = #tpu.dot_dimension_numbers<[2], [1], [1], [2], [0, 0, 0, 1, 1, 2], [0], [0]>} : vector<2x32x32xbf16>, vector<2x32x128xbf16>, vector<2x32x128xf32> -> vector<2x32x128xf32>
    "tpu.trace_stop"() : () -> ()
    %c0_5 = arith.constant 0 : index
    %c0_6 = arith.constant 0 : index
    %c0_7 = arith.constant 0 : index
    %3 = vector.load %arg6[%c0_5, %c0_6, %c0_7] : memref<2x32x128xf32, #tpu.memory_space<vmem>>, vector<2x32x128xf32>
    tpu.vector_store %arg6[%c0_5, %c0_6, %c0_7], %2 {strides = array<i32>} : memref<2x32x128xf32, #tpu.memory_space<vmem>>, vector<2x32x128xf32>,
    %4 = vector.shape_cast %2 : vector<2x32x128xf32> to vector<64x128xf32>
    %5 = arith.truncf %4 : vector<64x128xf32> to vector<64x128xbf16>
    %c0_8 = arith.constant 0 : index
    %c0_9 = arith.constant 0 : index
    %6 = vector.load %arg4[%c0_8, %c0_9] : memref<128x128xbf16, #tpu.memory_space<vmem>>, vector<128x128xbf16>
    %cst_10 = arith.constant dense<0.000000e+00> : vector<64x128xf32>
    %7 = tpu.matmul %5, %6, %cst_10 {dimension_numbers = #tpu.dot_dimension_numbers<[1], [0], [0], [1], [0, 0, 1, 1], [], []>} : vector<64x128xbf16>, vector<128x128xbf16>, vector<64x128xf32> -> vector<64x128xf32>
    %c0_11 = arith.constant 0 : index
    %c0_12 = arith.constant 0 : index
    %8 = vector.load %arg5[%c0_11, %c0_12] : memref<1x128xf32, #tpu.memory_space<vmem>>, vector<1x128xf32>
    %9 = vector.broadcast %8 : vector<1x128xf32> to vector<64x128xf32>
    %10 = arith.addf %7, %9 : vector<64x128xf32>
    %11 = vector.shape_cast %10 : vector<64x128xf32> to vector<2x32x128xf32>
    %12 = tpu.iota {dimensions = array<i32: 2>} : vector<2x32x128xi32>
    %cst_13 = arith.constant dense<0xFF800000> : vector<2x32xf32>
    %13 = vector.multi_reduction <maximumf>, %11, %cst_13 [2] : vector<2x32x128xf32> to vector<2x32xf32>
    %14 = vector.shape_cast %13 : vector<2x32xf32> to vector<2x32x1xf32>
    %15 = vector.broadcast %14 : vector<2x32x1xf32> to vector<2x32x128xf32>
    %16 = arith.cmpf oge, %11, %15 : vector<2x32x128xf32>
    %c128_i32 = arith.constant 128 : i32
    %17 = vector.broadcast %c128_i32 : i32 to vector<2x32x128xi32>
    %18 = arith.select %16, %12, %17 : vector<2x32x128xi1>, vector<2x32x128xi32>
    %cst_14 = arith.constant dense<2147483647> : vector<2x32xi32>
    %19 = vector.multi_reduction <minsi>, %18, %cst_14 [2] : vector<2x32x128xi32> to vector<2x32xi32>
    %c0_15 = arith.constant 0 : index
    %c0_16 = arith.constant 0 : index
    %20 = vector.load %arg7[%c0_15, %c0_16] : memref<2x32xi32, #tpu.memory_space<vmem>>, vector<2x32xi32>
    tpu.vector_store %arg7[%c0_15, %c0_16], %19 {strides = array<i32>} : memref<2x32xi32, #tpu.memory_space<vmem>>, vector<2x32xi32>,
    %c0_17 = arith.constant 0 : index
    %c0_18 = arith.constant 0 : index
    %21 = vector.load %arg2[%c0_17, %c0_18] : memref<2x32xi32, #tpu.memory_space<vmem>>, vector<2x32xi32>
    %c0_19 = arith.constant 0 : index
    %c0_20 = arith.constant 0 : index
    %22 = vector.load %arg3[%c0_19, %c0_20] : memref<2x32xf32, #tpu.memory_space<vmem>>, vector<2x32xf32>
    %23 = vector.broadcast %14 : vector<2x32x1xf32> to vector<2x32x128xf32>
    %24 = arith.subf %11, %23 : vector<2x32x128xf32>
    %25 = math.exp %24 : vector<2x32x128xf32>
    %cst_21 = arith.constant dense<0.000000e+00> : vector<2x32xf32>
    %26 = vector.multi_reduction <add>, %25, %cst_21 [2] : vector<2x32x128xf32> to vector<2x32xf32>
    %27 = vector.shape_cast %26 : vector<2x32xf32> to vector<2x32x1xf32>
    %28 = math.log %27 : vector<2x32x1xf32>
    %29 = arith.addf %14, %28 : vector<2x32x1xf32>
    %30 = vector.shape_cast %21 : vector<2x32xi32> to vector<2x32x1xi32>
    %31 = vector.broadcast %30 : vector<2x32x1xi32> to vector<2x32x128xi32>
    %32 = arith.cmpi eq, %12, %31 : vector<2x32x128xi32>
    %33 = arith.extui %32 : vector<2x32x128xi1> to vector<2x32x128xi32>
    %34 = arith.sitofp %33 : vector<2x32x128xi32> to vector<2x32x128xf32>
    %35 = vector.broadcast %29 : vector<2x32x1xf32> to vector<2x32x128xf32>
    %36 = arith.subf %11, %35 : vector<2x32x128xf32>
    %37 = arith.mulf %34, %36 : vector<2x32x128xf32>
    %cst_22 = arith.constant dense<0.000000e+00> : vector<2x32xf32>
    %38 = vector.multi_reduction <add>, %37, %cst_22 [2] : vector<2x32x128xf32> to vector<2x32xf32>
    %cst_23 = arith.constant 0.000000e+00 : f32
    %39 = vector.broadcast %cst_23 : f32 to vector<2x32xf32>
    %40 = arith.subf %39, %38 : vector<2x32xf32>
    %41 = arith.mulf %40, %22 : vector<2x32xf32>
    %42 = vector.shape_cast %41 : vector<2x32xf32> to vector<1x2x32xf32>
    %cst_24 = arith.constant dense<0.000000e+00> : vector<1xf32>
    %43 = vector.multi_reduction <add>, %42, %cst_24 [1, 2] : vector<1x2x32xf32> to vector<1xf32>
    %44 = vector.shape_cast %43 : vector<1xf32> to vector<1x1x1xf32>
    %45 = vector.extract %44[0, 0, 0] : f32 from vector<1x1x1xf32>
    %46 = vector.shape_cast %22 : vector<2x32xf32> to vector<1x2x32xf32>
    %cst_25 = arith.constant dense<0.000000e+00> : vector<1xf32>
    %47 = vector.multi_reduction <add>, %46, %cst_25 [1, 2] : vector<1x2x32xf32> to vector<1xf32>
    %48 = vector.shape_cast %47 : vector<1xf32> to vector<1x1x1xf32>
    %49 = vector.extract %48[0, 0, 0] : f32 from vector<1x1x1xf32>
    %50 = tpu.iota {dimensions = array<i32: 1>} : vector<1x128xi32>
    %c0_i32 = arith.constant 0 : i32
    %51 = vector.broadcast %c0_i32 : i32 to vector<1x128xi32>
    %52 = arith.cmpi eq, %50, %51 : vector<1x128xi32>
    %cst_26 = arith.constant 0.000000e+00 : f32
    %53 = vector.broadcast %45 : f32 to vector<1x128xf32>
    %54 = vector.broadcast %cst_26 : f32 to vector<1x128xf32>
    %55 = arith.select %52, %53, %54 : vector<1x128xi1>, vector<1x128xf32>
    %c1_i32 = arith.constant 1 : i32
    %56 = vector.broadcast %c1_i32 : i32 to vector<1x128xi32>
    %57 = arith.cmpi eq, %50, %56 : vector<1x128xi32>
    %cst_27 = arith.constant 0.000000e+00 : f32
    %58 = vector.broadcast %49 : f32 to vector<1x128xf32>
    %59 = vector.broadcast %cst_27 : f32 to vector<1x128xf32>
    %60 = arith.select %57, %58, %59 : vector<1x128xi1>, vector<1x128xf32>
    %61 = arith.addf %55, %60 : vector<1x128xf32>
    %c0_28 = arith.constant 0 : index
    %c0_29 = arith.constant 0 : index
    %62 = vector.load %arg8[%c0_28, %c0_29] : memref<1x128xf32, #tpu.memory_space<vmem>>, vector<1x128xf32>
    tpu.vector_store %arg8[%c0_28, %c0_29], %61 {strides = array<i32>} : memref<1x128xf32, #tpu.memory_space<vmem>>, vector<1x128xf32>,
    return
  }
}

</mosaic_0001>

<bundles_post_ra>
// kernel: _ner_forward.1
= control target key start
LH: loop header
LB: loop body
LE: loop exit
PB: predicated region body
PF: predicated region fallthrough
CT: control target
= control target key end

     0   :  { %14 = vsyncpa [#allocation3], 0  ;;  %s1437_s0 = inlined_call_operand.vmem [shape: bf16[2,32,32], index: 0, kind: input, shape index: {}]   ;;  %s1438_s1 = inlined_call_operand.vmem [shape: bf16[2,32,128], index: 1, kind: input, shape index: {}]   ;;  %s1439_s2 = inlined_call_operand.vmem [shape: s32[2,32], index: 2, kind: input, shape index: {}]   ;;  %s1440_s3 = inlined_call_operand.vmem [shape: f32[2,32], index: 3, kind: input, shape index: {}]   ;;  %s1441_s4 = inlined_call_operand.vmem [shape: bf16[128,128], index: 4, kind: input, shape index: {}]   ;;  %s1442_s5 = inlined_call_operand.vmem [shape: f32[1,128], index: 5, kind: input, shape index: {}]   ;;  %s1443_s6 = inlined_call_operand.hbm [shape: f32[2,32,128], index: 6, kind: output, shape index: {0}]   ;;  %s1444_s7 = inlined_call_operand.hbm [shape: s32[2,32], index: 7, kind: output, shape index: {1}]   ;;  %s1445_s8 = inlined_call_operand.vmem [shape: f32[1,128], index: 8, kind: output, shape index: {2}]  }
   0x1   :  { %v861_v0 = vld [vmem:[%s1438_s1 + $0x8] sm:$0xff]  ;;  %v863_v1 = vld [vmem:[%s1438_s1 + $0x18] sm:$0xff]  ;;  %v860_v2 = vld [vmem:[%s1438_s1] sm:$0xff] }
   0x2   :  { %80 = vmatpush.bf16.msra.mxu0 %v861_v0  ;;  %127 = vmatpush.bf16.msra.mxu1 %v863_v1  ;;  %v862_v3 = vld [vmem:[%s1438_s1 + $0x10] sm:$0xff]  ;;  %v871_v4 = vld [vmem:[%s1441_s4 + $0x38] sm:$0xff]  ;;  %v856_v6 = vld [vmem:[%s1437_s0] sm:$0xff] }
   0x3   :  { %873 = vmatpush.bf16.msra.mxu2 %v871_v4  ;;  %v870_v5 = vld [vmem:[%s1441_s4 + $0x30] sm:$0xff]  ;;  %874 = vmatpush.bf16.msra.mxu3 %v871_v4 }
   0x4   :  { %v858_v7 = vld [vmem:[%s1437_s0 + $0x10] sm:$0xff] }
   0x5   :  { %15 = vsyncpa [#allocation5], 0  ;;  %vm67_vm0 = vcmask 261120   ;;  %v869_v8 = vld [vmem:[%s1441_s4 + $0x28] sm:$0xff]  ;;  %v868_v9 = vld [vmem:[%s1441_s4 + $0x20] sm:$0xff]  ;;  %v249_v16 = vlaneseq  ;;  %s748_s17 = sshll.u32 %s1443_s6, 4  ;;  %s749_s17 = int_to_ptr.hbm [resolvable:$true] %s748_s17 }
   0x6   :  { %81 = vmatpush.bf16.msra.mxu0 %v860_v2  ;;  %128 = vmatpush.bf16.msra.mxu1 %v862_v3  ;;  %v867_v10 = vld [vmem:[%s1441_s4 + $0x18] sm:$0xff]  ;;  %v866_v11 = vld [vmem:[%s1441_s4 + $0x10] sm:$0xff]  ;;  %v857_v12 = vld [vmem:[%s1437_s0 + $0x8] sm:$0xff]  ;;  %s1009_s18 = smov [#allocation2]   ;;  %s1010_s20 = smov 128  }
   0x7   :  { %876 = vmatpush.bf16.msra.mxu2 %v870_v5  ;;  %877 = vmatpush.bf16.msra.mxu3 %v870_v5  ;;  %v859_v13 = vld [vmem:[%s1437_s0 + $0x18] sm:$0xff]  ;;  %v865_v14 = vld [vmem:[%s1441_s4 + $0x8] sm:$0xff]  ;;  %v864_v15 = vld [vmem:[%s1441_s4] sm:$0xff]  ;;  %v487_v17 = vshrl.u32 %v249_v16, 7  ;;  %v1176_v62 = vand.u32 127, %v249_v16  ;;  %s746_s19 = sshll.u32 %s1009_s18, 4  ;;  %s747_s19 = int_to_ptr.vmem [resolvable:$true] %s746_s19 }
   0x8   :  { %v419_v21 = vld [vmem:[%s1439_s2] sm:$0x3]  ;;  %s1011_s1 = smov 8   ;;  %s1012_s24 = smov [#allocation4]  }
   0x9   :  { %796 = vmatmul.msk.bf16.vlgmr.msra.gmra.mxu0 %vm67_vm0, %v856_v6  ;;  %814 = vmatmul.msk.bf16.vlgmr.msra.gmra.mxu1 %vm67_vm0, %v858_v7  ;;  %v494_v18 = vadd.s32 8, %v487_v17  ;;  %v1114_v22 = vperm.slane %v419_v21, 1  ;;  %v485_v23 = vperm.slane %v419_v21, 0  ;;  %v1120_v26 = vld [vmem:[%s1440_s3] sm:$0x3]  ;;  %v500_v30 = vadd.s32 16, %v487_v17 }
   0xa   :  { %220 = vmatpush.bf16.msrb.mxu0 %v871_v4  ;;  %872 = vmatpush.bf16.msrb.mxu1 %v871_v4  ;;  %v1123_v29 = vperm.slane %v1120_v26, 0  ;;  %v506_v33 = vadd.s32 24, %v487_v17  ;;  %v922_v38 = vld [vmem:[%s1442_s5] ss:$0 sm:$0xff]  ;;  %v1154_v53 = vperm.slane %v1120_v26, 1  ;;  %s760_s25 = sshll.u32 %s1012_s24, 4  ;;  %s761_s25 = int_to_ptr.vmem [resolvable:$true] %s760_s25 }
   0xb   :  { %879 = vmatpush.bf16.msra.mxu2 %v869_v8  ;;  %880 = vmatpush.bf16.msra.mxu3 %v869_v8  ;;  %s762_s28 = sshll.u32 %s1444_s7, 4  ;;  %s763_s28 = int_to_ptr.hbm [resolvable:$true] %s762_s28 }
   0xc   :  { %906 = vset.pattern.permute.xlu0 %v487_v17  ;;  %908 = vset.pattern.permute.xlu2 %v487_v17 }
   0xd   :  { %907 = vset.pattern.permute.xlu1 %v494_v18 }
   0xe   :  { %221 = vmatpush.bf16.msrb.mxu0 %v870_v5  ;;  %875 = vmatpush.bf16.msrb.mxu1 %v870_v5 }
   0xf   :  { %882 = vmatpush.bf16.msra.mxu2 %v868_v9  ;;  %883 = vmatpush.bf16.msra.mxu3 %v868_v9 }
  0x12   :  { %222 = vmatpush.bf16.msrb.mxu0 %v869_v8  ;;  %878 = vmatpush.bf16.msrb.mxu1 %v869_v8 }
  0x13   :  { %885 = vmatpush.bf16.msra.mxu2 %v867_v10  ;;  %886 = vmatpush.bf16.msra.mxu3 %v867_v10 }
  0x14   :  { %490 = vperm.xlu0 %906, %v485_v23   ;;  %515 = vperm.xlu2 %908, %v1114_v22  }
  0x15   :  { %496 = vperm.xlu1 %907, %v485_v23  }
  0x16   :  { %223 = vmatpush.bf16.msrb.mxu0 %v868_v9  ;;  %881 = vmatpush.bf16.msrb.mxu1 %v868_v9 }
  0x17   :  { %888 = vmatpush.bf16.msra.mxu2 %v866_v11  ;;  %889 = vmatpush.bf16.msra.mxu3 %v866_v11 }
  0x19   :  { %797 = vmatmul.msk.bf16.gmra.mxu0 %vm67_vm0, %v857_v12  ;;  %815 = vmatmul.msk.bf16.gmra.mxu1 %vm67_vm0, %v859_v13 }
  0x1a   :  { %224 = vmatpush.bf16.msrb.mxu0 %v867_v10  ;;  %884 = vmatpush.bf16.msrb.mxu1 %v867_v10 }
  0x1b   :  { %891 = vmatpush.bf16.msra.mxu2 %v865_v14  ;;  %892 = vmatpush.bf16.msra.mxu3 %v865_v14 }
  0x1c   :  { %605 = vperm.xlu0 %906, %v1123_v29   ;;  %909 = vset.pattern.permute.xlu2 %v494_v18 }
  0x1d   :  { %910 = vset.pattern.permute.xlu1 %v500_v30 }
  0x1e   :  { %225 = vmatpush.bf16.msrb.mxu0 %v866_v11  ;;  %887 = vmatpush.bf16.msrb.mxu1 %v866_v11 }
  0x1f   :  { %894 = vmatpush.bf16.msra.mxu2 %v864_v15  ;;  %895 = vmatpush.bf16.msra.mxu3 %v864_v15 }
  0x22   :  { %226 = vmatpush.bf16.msrb.mxu0 %v865_v14  ;;  %890 = vmatpush.bf16.msrb.mxu1 %v865_v14 }
  0x24   :  { %521 = vperm.xlu2 %909, %v1114_v22   ;;  %913 = vset.pattern.permute.xlu0 %v506_v33 }
  0x25   :  { %502 = vperm.xlu1 %910, %v485_v23  }
  0x26   :  { %227 = vmatpush.bf16.msrb.mxu0 %v864_v15  ;;  %893 = vmatpush.bf16.msrb.mxu1 %v864_v15 }
  0x2c   :  { %911 = vset.pattern.permute.xlu2 %v500_v30 }
  0x2d   :  { %912 = vset.pattern.permute.xlu1 %v506_v33 }
  0x34   :  { %527 = vperm.xlu2 %911, %v1114_v22  }
  0x35   :  { %508 = vperm.xlu1 %912, %v485_v23  }
  0x3c   :  { %915 = vset.pattern.permute.xlu2 %v487_v17 }
  0x3d   :  { %914 = vset.pattern.permute.xlu1 %v494_v18 }
  0x6e   :  { %v1169_v59 = vpop.permute.xlu2 %515 }
  0x6f   :  { %vm539_vm15 = vcmp.eq.s32.totalorder %v1176_v62, %v1169_v59 }
  0x7e   :  { %v1178_v63 = vpop.permute.xlu2 %521 }
  0x7f   :  { %vm540_vm0 = vcmp.eq.s32.totalorder %v1176_v62, %v1178_v63 }
  0x86   :  { %v83_v19 = vpop.f32.mrf.mxu0  ;;  %v130_v20 = vpop.f32.mrf.mxu1 }
  0x87   :  { %140 = vst [vmem:[#allocation2] sm:$0xff] %v83_v19  ;;  %v1163_v56 = vpop.permute.xlu1 %496  ;;  %v1165_v57 = vpop.permute.xlu0 %490 }
  0x88   :  { %144 = vst [vmem:[#allocation2 + $0x20] sm:$0xff] %v130_v20  ;;  %vm535_vm11 = vcmp.eq.s32.totalorder %v1176_v62, %v1165_v57  ;;  %vm536_vm14 = vcmp.eq.s32.totalorder %v1176_v62, %v1163_v56 }
  0x8e   :  { %v85_v24 = vpop.f32.mrf.mxu0  ;;  %v132_v25 = vpop.f32.mrf.mxu1 }
  0x8f   :  { %141 = vst [vmem:[#allocation2 + $0x8] sm:$0xff] %v85_v24  ;;  %v148_v27 = vpack.c.bf16 %v85_v24, %v83_v19  ;;  %v150_v28 = vpack.c.bf16 %v132_v25, %v130_v20  ;;  %v1171_v60 = vpop.permute.xlu0 %605  ;;  %v1197_v8 = vpop.permute.xlu2 %527 }
  0x90   :  { %145 = vst [vmem:[#allocation2 + $0x28] sm:$0xff] %v132_v25 }
  0x91   :  { %228 = vmatmul.bf16.vlgmr.msrb.gmra.mxu0 %v148_v27  ;;  %238 = vmatmul.bf16.vlgmr.msra.gmra.mxu2 %v150_v28 }
  0x96   :  { %v88_v31 = vpop.f32.mrf.mxu0  ;;  %v135_v32 = vpop.f32.mrf.mxu1 }
  0x97   :  { %142 = vst [vmem:[#allocation2 + $0x10] sm:$0xff] %v88_v31  ;;  %v1167_v58 = vpop.permute.xlu1 %502 }
  0x98   :  { %146 = vst [vmem:[#allocation2 + $0x30] sm:$0xff] %v135_v32 }
  0x9e   :  { %v90_v34 = vpop.f32.mrf.mxu0  ;;  %v137_v35 = vpop.f32.mrf.mxu1 }
  0x9f   :  { %143 = vst [vmem:[#allocation2 + $0x18] sm:$0xff] %v90_v34  ;;  %v149_v36 = vpack.c.bf16 %v90_v34, %v88_v31  ;;  %v151_v37 = vpack.c.bf16 %v137_v35, %v135_v32 }
  0xa0   :  { %147 = vst [vmem:[#allocation2 + $0x38] sm:$0xff] %v137_v35 }
  0xa1   :  { %233 = vmatmul.bf16.vlgmr.msrb.gmra.mxu1 %v149_v36  ;;  %243 = vmatmul.bf16.vlgmr.msra.gmra.mxu3 %v151_v37  ;;  %754 = dma.vmem_to_hbm [thread:$0]  %s747_s19, 1024, %s749_s17, [#allocation3], %s1010_s20, %s1010_s20, %s1011_s1  }
  0xa7   :  { %v1173_v61 = vpop.permute.xlu1 %508 }
 0x10e   :  { %v229_v39 = vpop.f32.mrf.mxu0 }
 0x10f   :  { %v1131_v40 = vadd.f32 %v922_v38, %v229_v39 }
 0x111   :  { %251 = vmax.xlane.f32.xlu0 %v1131_v40 }
 0x114   :  { %v239_v41 = vpop.f32.mrf.mxu2 }
 0x115   :  { %v1134_v42 = vadd.f32 %v922_v38, %v239_v41 }
 0x116   :  { %v231_v43 = vpop.f32.mrf.mxu0 }
 0x117   :  { %v1136_v44 = vadd.f32 %v922_v38, %v231_v43  ;;  %259 = vmax.xlane.f32.xlu1 %v1134_v42 }
 0x119   :  { %253 = vmax.xlane.f32.xlu0 %v1136_v44 }
 0x11c   :  { %v241_v45 = vpop.f32.mrf.mxu2 }
 0x11d   :  { %v1140_v46 = vadd.f32 %v922_v38, %v241_v45 }
 0x11e   :  { %v234_v47 = vpop.f32.mrf.mxu1 }
 0x11f   :  { %v1142_v48 = vadd.f32 %v922_v38, %v234_v47  ;;  %261 = vmax.xlane.f32.xlu1 %v1140_v46 }
 0x121   :  { %255 = vmax.xlane.f32.xlu2 %v1142_v48 }
 0x124   :  { %v244_v49 = vpop.f32.mrf.mxu3 }
 0x125   :  { %v1146_v50 = vadd.f32 %v922_v38, %v244_v49 }
 0x126   :  { %v236_v51 = vpop.f32.mrf.mxu1 }
 0x127   :  { %v1148_v52 = vadd.f32 %v922_v38, %v236_v51 }
 0x129   :  { %257 = vmax.xlane.f32.xlu0 %v1148_v52  ;;  %263 = vmax.xlane.f32.xlu2 %v1146_v50 }
 0x12c   :  { %v246_v54 = vpop.f32.mrf.mxu3 }
 0x12d   :  { %v1160_v55 = vadd.f32 %v922_v38, %v246_v54 }
 0x138   :  { %611 = vperm.xlu1 %914, %v1123_v29  }
 0x13d   :  { %533 = vperm.xlu0 %913, %v1114_v22  }
 0x140   :  { %636 = vperm.xlu1 %914, %v1154_v53  }
 0x141   :  { %630 = vperm.xlu2 %915, %v1154_v53  }
 0x148   :  { %917 = vset.pattern.permute.xlu1 %v500_v30 }
 0x149   :  { %916 = vset.pattern.permute.xlu2 %v500_v30 }
 0x151   :  { %617 = vperm.xlu2 %916, %v1123_v29  }
 0x159   :  { %918 = vset.pattern.permute.xlu2 %v506_v33 }
 0x16a   :  { %265 = vmax.xlane.f32.xlu1 %v1160_v55 }
 0x184   :  { %v1180_v0 = vpop.xlane.xlu0 %251 }
 0x185   :  { %vm267_vm1 = vcmp.ge.f32.partialorder %v1131_v40, %v1180_v0  ;;  %v421_v1 = vsub.f32 %v1131_v40, %v1180_v0 }
 0x186   :  { %v1187_v2 = vsel %vm267_vm1, %v1176_v62, 128  ;;  %vm537_vm1 = vcmp.eq.s32.totalorder %v1176_v62, %v1167_v58 }
 0x187   :  { %v429_v3 = vmul.f32 1.442695, %v421_v1  ;;  %v284_v4 = vshra.s32 %v1187_v2, 16 }
 0x189   :  { %923 = vpow2.f32 %v429_v3  ;;  %v1190_v5 = vcvt.s32.f32 %v284_v4 }
 0x18a   :  { %v1192_v6 = vpop.xlane.xlu1 %259 }
 0x18b   :  { %v425_v7 = vsub.f32 %v1134_v42, %v1192_v6  ;;  %287 = vmin.xlane.f32.xlu2 %v1190_v5  ;;  %vm271_vm2 = vcmp.ge.f32.partialorder %v1134_v42, %v1192_v6 }
 0x18c   :  { %v1201_v9 = vpop.xlane.xlu0 %253  ;;  %v1206_v14 = vsel %vm271_vm2, %v1176_v62, 128  ;;  %vm541_vm2 = vcmp.eq.s32.totalorder %v1176_v62, %v1197_v8 }
 0x18d   :  { %v437_v10 = vmul.f32 1.442695, %v425_v7  ;;  %v422_v11 = vsub.f32 %v1136_v44, %v1201_v9  ;;  %v340_v16 = vshra.s32 %v1206_v14, 16  ;;  %vm268_vm4 = vcmp.ge.f32.partialorder %v1136_v44, %v1201_v9 }
 0x18e   :  { %v1225_v24 = vsel %vm268_vm4, %v1176_v62, 128 }
 0x18f   :  { %v924_v12 = vpop.eup %923  ;;  %925 = vpow2.f32 %v437_v10  ;;  %v431_v13 = vmul.f32 1.442695, %v422_v11  ;;  %v1222_v21 = vcvt.s32.f32 %v340_v16  ;;  %v298_v28 = vshra.s32 %v1225_v24, 16 }
 0x190   :  { %445 = vadd.xlane.f32.xlu1 %v924_v12 }
 0x191   :  { %927 = vpow2.f32 %v431_v13  ;;  %v1246_v35 = vcvt.s32.f32 %v298_v28  ;;  %v339_v28 = vand.u32 65535, %v1206_v14 }
 0x192   :  { %v1208_v15 = vpop.xlane.xlu1 %261 }
 0x193   :  { %vm272_vm3 = vcmp.ge.f32.partialorder %v1140_v46, %v1208_v15  ;;  %v426_v27 = vsub.f32 %v1140_v46, %v1208_v15 }
 0x194   :  { %v1215_v17 = vpop.xlane.xlu2 %255  ;;  %v1220_v20 = vsel %vm272_vm3, %v1176_v62, 128  ;;  %vm538_vm3 = vcmp.eq.s32.totalorder %v1176_v62, %v1173_v61 }
 0x195   :  { %v926_v18 = vpop.eup %925  ;;  %v423_v19 = vsub.f32 %v1142_v48, %v1215_v17  ;;  %v354_v25 = vshra.s32 %v1220_v20, 16  ;;  %vm269_vm5 = vcmp.ge.f32.partialorder %v1142_v48, %v1215_v17  ;;  %v439_v33 = vmul.f32 1.442695, %v426_v27 }
 0x196   :  { %453 = vadd.xlane.f32.xlu0 %v926_v18  ;;  %v1243_v34 = vsel %vm269_vm5, %v1176_v62, 128  ;;  %vm398_vm5 = vcmask 130112  }
 0x197   :  { %v928_v22 = vpop.eup %927  ;;  %v433_v23 = vmul.f32 1.442695, %v423_v19  ;;  %v1238_v32 = vcvt.s32.f32 %v354_v25  ;;  %v312_v39 = vshra.s32 %v1243_v34, 16 }
 0x198   :  { %343 = vmin.xlane.f32.xlu1 %v1222_v21  ;;  %447 = vadd.xlane.f32.xlu2 %v928_v22 }
 0x199   :  { %929 = vpow2.f32 %v433_v23  ;;  %v1258_v47 = vcvt.s32.f32 %v312_v39  ;;  %v341_v39 = vcvt.s32.f32 %v339_v28 }
 0x19a   :  { %931 = vpow2.f32 %v439_v33 }
 0x19c   :  { %v1234_v30 = vpop.xlane.xlu0 %257  ;;  %v1236_v31 = vpop.xlane.xlu2 %263 }
 0x19d   :  { %vm270_vm6 = vcmp.ge.f32.partialorder %v1148_v52, %v1234_v30  ;;  %v427_v37 = vsub.f32 %v1146_v50, %v1236_v31  ;;  %v424_v41 = vsub.f32 %v1148_v52, %v1234_v30 }
 0x19e   :  { %357 = vmin.xlane.f32.xlu0 %v1238_v32  ;;  %v1251_v38 = vsel %vm270_vm6, %v1176_v62, 128  ;;  %vm402_vm6 = vcmask 195712  }
 0x19f   :  { %v930_v36 = vpop.eup %929  ;;  %v326_v43 = vshra.s32 %v1251_v38, 16  ;;  %v441_v45 = vmul.f32 1.442695, %v427_v37  ;;  %v435_v49 = vmul.f32 1.442695, %v424_v41 }
 0x1a0   :  { %301 = vmin.xlane.f32.xlu1 %v1246_v35  ;;  %449 = vadd.xlane.f32.xlu2 %v930_v36  ;;  %v932_v54 = vpop.eup %931 }
 0x1a1   :  { %v1261_v51 = vcvt.s32.f32 %v326_v43  ;;  %933 = vpow2.f32 %v441_v45  ;;  %v353_v43 = vand.u32 65535, %v1220_v20 }
 0x1a2   :  { %935 = vpow2.f32 %v435_v49 }
 0x1a3   :  { %v355_v14 = vcvt.s32.f32 %v353_v43 }
 0x1a4   :  { %v1274_v16 = vpop.permute.xlu2 %630 }
 0x1a6   :  { %315 = vmin.xlane.f32.xlu0 %v1258_v47 }
 0x1a7   :  { %v934_v1 = vpop.eup %933 }
 0x1a8   :  { %455 = vadd.xlane.f32.xlu1 %v932_v54  ;;  %329 = vmin.xlane.f32.xlu2 %v1261_v51  ;;  %v936_v3 = vpop.eup %935 }
 0x1aa   :  { %v1266_v4 = vpop.permute.xlu1 %611 }
 0x1ac   :  { %v1276_v18 = vpop.permute.xlu2 %617 }
 0x1ae   :  { %457 = vadd.xlane.f32.xlu0 %v934_v1 }
 0x1af   :  { %v1281_v23 = vpop.permute.xlu0 %533 }
 0x1b0   :  { %451 = vadd.xlane.f32.xlu1 %v936_v3  ;;  %vm542_vm4 = vcmp.eq.s32.totalorder %v1176_v62, %v1281_v23 }
 0x1b2   :  { %v1268_v7 = vpop.permute.xlu1 %636 }
 0x1c0   :  { %623 = vperm.xlu2 %918, %v1123_v29   ;;  %v283_v29 = vand.u32 65535, %v1187_v2 }
 0x1c2   :  { %v285_v22 = vcvt.s32.f32 %v283_v29 }
 0x1c9   :  { %642 = vperm.xlu1 %917, %v1154_v53  }
 0x1dd   :  { %v1270_v10 = vpop.xlane.xlu1 %265 }
 0x1de   :  { %v428_v11 = vsub.f32 %v1160_v55, %v1270_v10 }
 0x1e0   :  { %v443_v12 = vmul.f32 1.442695, %v428_v11 }
 0x1e2   :  { %937 = vpow2.f32 %v443_v12 }
 0x1e8   :  { %v938_v13 = vpop.eup %937 }
 0x1e9   :  { %459 = vadd.xlane.f32.xlu2 %v938_v13  ;;  %v311_v13 = vand.u32 65535, %v1243_v34  ;;  %v1007_v34 = vmov 0.0  }
 0x1ea   :  { %v849_v43 = vsel %vm536_vm14, 1.0, %v1007_v34  ;;  %v852_v56 = vsel %vm539_vm15, 1.0, %v1007_v34  ;;  %vm734_vm14 = vcmp.eq.s32.totalorder %v1176_v62, 0  ;;  %vm737_vm15 = vcmp.eq.s32.totalorder %v1176_v62, 1 }
 0x1fe   :  { %v1279_v19 = vpop.xlane.xlu2 %287 }
 0x1ff   :  { %vm289_vm7 = vcmp.eq.f32.partialorder %v1190_v5, %v1279_v19  ;;  %v297_v5 = vand.u32 65535, %v1225_v24 }
 0x200   :  { %v290_v25 = vsel %vm289_vm7, %v285_v22, inf  ;;  %vm406_vm7 = vcmask 261312  }
 0x201   :  { %291 = vmin.xlane.f32.xlu0 %v290_v25  ;;  %v299_v3 = vcvt.s32.f32 %v297_v5 }
 0x203   :  { %v446_v27 = vpop.xlane.xlu1 %445 }
 0x204   :  { %939 = vlog2.f32 %v446_v27 }
 0x209   :  { %v454_v33 = vpop.xlane.xlu0 %453 }
 0x20a   :  { %v940_v2 = vpop.eup %939 }
 0x20b   :  { %v1286_v36 = vpop.xlane.xlu1 %343  ;;  %v448_v37 = vpop.xlane.xlu2 %447  ;;  %v462_v45 = vmul.f32 0.6931472, %v940_v2 }
 0x20c   :  { %vm345_vm8 = vcmp.eq.f32.partialorder %v1222_v21, %v1286_v36  ;;  %941 = vlog2.f32 %v448_v37  ;;  %v350_v23 = vcvt.f32.s32 %v1286_v36 }
 0x20d   :  { %v346_v41 = vsel %vm345_vm8, %v341_v39, inf  ;;  %943 = vlog2.f32 %v454_v33  ;;  %v477_v20 = vadd.f32 %v462_v45, %v1180_v0  ;;  %v313_v0 = vcvt.s32.f32 %v311_v13 }
 0x20e   :  { %347 = vmin.xlane.f32.xlu2 %v346_v41  ;;  %v848_v33 = vsel %vm535_vm11, 1.0, %v1007_v34  ;;  %vm417_vm8 = vcmask 254976   ;;  %vm274_vm11 = vcmp.ge.f32.partialorder %v1160_v55, %v1270_v10 }
 0x20f   :  { %v559_v25 = vsub.f32 %v1131_v40, %v477_v20  ;;  %v853_v20 = vsel %vm540_vm0, 1.0, %v1007_v34 }
 0x211   :  { %v1292_v49 = vpop.xlane.xlu0 %357  ;;  %v567_v40 = vmul.f32 %v848_v33, %v559_v25  ;;  %v851_v25 = vsel %vm538_vm3, 1.0, %v1007_v34 }
 0x212   :  { %vm359_vm9 = vcmp.eq.f32.partialorder %v1238_v32, %v1292_v49  ;;  %v942_v54 = vpop.eup %941  ;;  %v325_v32 = vand.u32 65535, %v1251_v38 }
 0x213   :  { %v1296_v1 = vpop.xlane.xlu1 %301  ;;  %v450_v21 = vpop.xlane.xlu2 %449  ;;  %v1298_v11 = vsel %vm359_vm9, %v355_v14, inf  ;;  %v464_v29 = vmul.f32 0.6931472, %v942_v54  ;;  %vm273_vm9 = vcmp.ge.f32.partialorder %v1146_v50, %v1236_v31 }
 0x214   :  { %vm303_vm10 = vcmp.eq.f32.partialorder %v1246_v35, %v1296_v1  ;;  %v944_v24 = vpop.eup %943  ;;  %945 = vlog2.f32 %v450_v21  ;;  %v327_v57 = vcvt.s32.f32 %v325_v32 }
 0x215   :  { %v304_v12 = vsel %vm303_vm10, %v299_v3, inf  ;;  %v470_v22 = vmul.f32 0.6931472, %v944_v24  ;;  %v478_v35 = vadd.f32 %v464_v29, %v1201_v9  ;;  %v850_v24 = vsel %vm537_vm1, 1.0, %v1007_v34 }
 0x216   :  { %305 = vmin.xlane.f32.xlu2 %v304_v12  ;;  %vm415_vm10 = vcmask 1041409  }
 0x217   :  { %v481_v2 = vadd.f32 %v470_v22, %v1192_v6  ;;  %v560_v41 = vsub.f32 %v1136_v44, %v478_v35  ;;  %v854_v22 = vsel %vm541_vm2, 1.0, %v1007_v34 }
 0x219   :  { %v1308_v27 = vpop.xlane.xlu0 %315  ;;  %v563_v6 = vsub.f32 %v1134_v42, %v481_v2  ;;  %v568_v14 = vmul.f32 %v849_v43, %v560_v41 }
 0x21a   :  { %vm317_vm12 = vcmp.eq.f32.partialorder %v1258_v47, %v1308_v27  ;;  %v946_v28 = vpop.eup %945 }
 0x21b   :  { %v456_v37 = vpop.xlane.xlu1 %455  ;;  %v1314_v38 = vpop.xlane.xlu2 %329  ;;  %v318_v39 = vsel %vm317_vm12, %v313_v0, inf  ;;  %v466_v47 = vmul.f32 0.6931472, %v946_v28  ;;  %v571_v44 = vmul.f32 %v852_v56, %v563_v6  ;;  %v351_v6 = vshll.u32 %v350_v23, 16 }
 0x21c   :  { %947 = vlog2.f32 %v456_v37  ;;  %319 = vmin.xlane.f32.xlu1 %v318_v39  ;;  %vm331_vm13 = vcmp.eq.f32.partialorder %v1261_v51, %v1314_v38  ;;  %v855_v37 = vsel %vm542_vm4, 1.0, %v1007_v34 }
 0x21d   :  { %v332_v9 = vsel %vm331_vm13, %v327_v57, inf  ;;  %v479_v51 = vadd.f32 %v466_v47, %v1215_v17  ;;  %v294_v57 = vcvt.f32.s32 %v1279_v19 }
 0x21e   :  { %575 = vadd.xlane.f32.xlu2 %v567_v40  ;;  %333 = vmin.xlane.f32.xlu0 %v332_v9  ;;  %v1008_v9 = vmov 0  }
 0x21f   :  { %v561_v59 = vsub.f32 %v1142_v48, %v479_v51  ;;  %v295_v2 = vshll.u32 %v294_v57, 16  ;;  %919 = vset.pattern.permute.xlu1 %v1008_v9  ;;  %920 = vset.pattern.permute.xlu2 %v1008_v9 }
 0x221   :  { %v458_v5 = vpop.xlane.xlu0 %457  ;;  %v569_v32 = vmul.f32 %v850_v24, %v561_v59 }
 0x222   :  { %v948_v45 = vpop.eup %947  ;;  %949 = vlog2.f32 %v458_v5 }
 0x223   :  { %v472_v54 = vmul.f32 0.6931472, %v948_v45  ;;  %v452_v21 = vpop.xlane.xlu1 %451  ;;  %v1348_v8 = vpop.permute.xlu2 %623  ;;  %v308_v45 = vcvt.f32.s32 %v1296_v1 }
 0x224   :  { %951 = vlog2.f32 %v452_v21  ;;  %577 = vadd.xlane.f32.xlu1 %v568_v14  ;;  %v1361_v14 = vadd.s32 4294967288, %v1176_v62 }
 0x225   :  { %v482_v42 = vadd.f32 %v472_v54, %v1208_v15  ;;  %v309_v19 = vshll.u32 %v308_v45, 16  ;;  %v322_v54 = vcvt.f32.s32 %v1308_v27 }
 0x226   :  { %583 = vadd.xlane.f32.xlu0 %v571_v44  ;;  %v336_v44 = vcvt.f32.s32 %v1314_v38 }
 0x227   :  { %v564_v17 = vsub.f32 %v1140_v46, %v482_v42 }
 0x228   :  { %v950_v3 = vpop.eup %949  ;;  %v337_v24 = vshll.u32 %v336_v44, 16 }
 0x229   :  { %v474_v12 = vmul.f32 0.6931472, %v950_v3  ;;  %v572_v13 = vmul.f32 %v853_v20, %v564_v17  ;;  %v323_v17 = vshll.u32 %v322_v54, 16  ;;  %v1369_v3 = vadd.s32 4294967280, %v1176_v62 }
 0x22a   :  { %v952_v29 = vpop.eup %951 }
 0x22b   :  { %v483_v63 = vadd.f32 %v474_v12, %v1236_v31  ;;  %v468_v15 = vmul.f32 0.6931472, %v952_v29  ;;  %585 = vadd.xlane.f32.xlu2 %v572_v13  ;;  %v1372_v29 = vadd.s32 4294967272, %v1176_v62 }
 0x22c   :  { %579 = vadd.xlane.f32.xlu1 %v569_v32 }
 0x22d   :  { %v480_v46 = vadd.f32 %v468_v15, %v1234_v30  ;;  %v565_v48 = vsub.f32 %v1146_v50, %v483_v63 }
 0x22f   :  { %v562_v58 = vsub.f32 %v1148_v52, %v480_v46  ;;  %v573_v0 = vmul.f32 %v854_v22, %v565_v48 }
 0x231   :  { %v570_v35 = vmul.f32 %v851_v25, %v562_v58 }
 0x233   :  { %587 = vadd.xlane.f32.xlu2 %v573_v0 }
 0x234   :  { %581 = vadd.xlane.f32.xlu1 %v570_v35 }
 0x23a   :  { %648 = vperm.xlu0 %913, %v1154_v53  }
 0x23b   :  { %v643_v34 = vpop.permute.xlu1 %642 }
 0x242   :  { %921 = vset.pattern.permute.xlu0 %v1008_v9 }
 0x25c   :  { %v460_v28 = vpop.xlane.xlu2 %459 }
 0x25d   :  { %953 = vlog2.f32 %v460_v28 }
 0x263   :  { %v954_v61 = vpop.eup %953 }
 0x264   :  { %v476_v30 = vmul.f32 0.6931472, %v954_v61 }
 0x266   :  { %v484_v52 = vadd.f32 %v476_v30, %v1270_v10 }
 0x268   :  { %v566_v33 = vsub.f32 %v1160_v55, %v484_v52 }
 0x26a   :  { %v574_v39 = vmul.f32 %v855_v37, %v566_v33 }
 0x26c   :  { %589 = vadd.xlane.f32.xlu2 %v574_v39 }
 0x274   :  { %v292_v53 = vpop.xlane.xlu0 %291 }
 0x275   :  { %v293_v40 = vcvt.f32.s32 %v292_v53 }
 0x277   :  { %v296_v47 = vadd.s32 %v295_v2, %v293_v40 }
 0x279   :  { %v395_v36 = vperm.slane %v296_v47, %v1176_v62 }
 0x281   :  { %v348_v41 = vpop.xlane.xlu2 %347 }
 0x282   :  { %v349_v43 = vcvt.f32.s32 %v348_v41 }
 0x284   :  { %v1357_v5 = vadd.s32 %v351_v6, %v349_v43  ;;  %v281_v6 = vsel %vm273_vm9, %v1176_v62, 128 }
 0x286   :  { %v408_v50 = vperm.slane %v1357_v5, %v1176_v62 }
 0x289   :  { %v306_v51 = vpop.xlane.xlu2 %305 }
 0x28a   :  { %v307_v56 = vcvt.f32.s32 %v306_v51 }
 0x28c   :  { %v310_v21 = vadd.s32 %v309_v19, %v307_v56  ;;  %v364_v19 = vcvt.f32.s32 %v1292_v49 }
 0x28e   :  { %v397_v42 = vperm.slane %v310_v21, %v1361_v14  ;;  %v365_v54 = vshll.u32 %v364_v19, 16 }
 0x28f   :  { %v320_v59 = vpop.xlane.xlu1 %319 }
 0x290   :  { %v399_v1 = vsel %vm398_vm5, %v397_v42, %v395_v36  ;;  %v321_v20 = vcvt.f32.s32 %v320_v59 }
 0x291   :  { %v334_v12 = vpop.xlane.xlu0 %333  ;;  %v576_v13 = vpop.xlane.xlu2 %575 }
 0x292   :  { %v324_v27 = vadd.s32 %v323_v17, %v321_v20  ;;  %v335_v38 = vcvt.f32.s32 %v334_v12  ;;  %v591_v32 = vsub.f32 0.0, %v576_v13 }
 0x294   :  { %v401_v63 = vperm.slane %v324_v27, %v1369_v3  ;;  %v338_v15 = vadd.s32 %v337_v24, %v335_v38  ;;  %v658_v46 = vmul.f32 %v1171_v60, %v591_v32 }
 0x296   :  { %v405_v48 = vperm.slane %v338_v15, %v1372_v29  ;;  %675 = vperm.xlu1 %919, %v658_v46   ;;  %v403_v58 = vsel %vm402_vm6, %v401_v63, %v399_v1 }
 0x297   :  { %v578_v22 = vpop.xlane.xlu1 %577 }
 0x298   :  { %v592_v25 = vsub.f32 0.0, %v578_v22  ;;  %v1379_v0 = vsel %vm406_vm7, %v405_v48, %v403_v58 }
 0x299   :  { %v584_v35 = vpop.xlane.xlu0 %583 }
 0x29a   :  { %v659_v28 = vmul.f32 %v1266_v4, %v592_v25  ;;  %v595_v61 = vsub.f32 0.0, %v584_v35  ;;  %v282_v25 = vsel %vm274_vm11, %v1176_v62, 128 }
 0x29b   :  { %v382_v35 = vshra.s32 %v282_v25, 16 }
 0x29c   :  { %v662_v30 = vmul.f32 %v1274_v16, %v595_v61  ;;  %678 = vperm.xlu2 %920, %v659_v28   ;;  %v724_v16 = vsel %vm417_vm8, %v1120_v26, 0.0  ;;  %v367_v61 = vand.u32 65535, %v281_v6 }
 0x29d   :  { %v384_v28 = vcvt.s32.f32 %v382_v35 }
 0x29e   :  { %687 = vperm.xlu1 %919, %v662_v30   ;;  %v586_v60 = vpop.xlane.xlu2 %585 }
 0x29f   :  { %v596_v52 = vsub.f32 0.0, %v586_v60  ;;  %v580_v33 = vpop.xlane.xlu1 %579  ;;  %v369_v60 = vcvt.s32.f32 %v367_v61 }
 0x2a0   :  { %v593_v37 = vsub.f32 0.0, %v580_v33 }
 0x2a1   :  { %v663_v39 = vmul.f32 %v1268_v7, %v596_v52 }
 0x2a2   :  { %v660_v57 = vmul.f32 %v1276_v18, %v593_v37 }
 0x2a4   :  { %681 = vperm.xlu0 %921, %v660_v57   ;;  %690 = vperm.xlu2 %920, %v663_v39  }
 0x2a6   :  { %v588_v53 = vpop.xlane.xlu2 %587 }
 0x2a7   :  { %v597_v2 = vsub.f32 0.0, %v588_v53  ;;  %v582_v40 = vpop.xlane.xlu1 %581 }
 0x2a8   :  { %v594_v9 = vsub.f32 0.0, %v582_v40 }
 0x2a9   :  { %v664_v4 = vmul.f32 %v643_v34, %v597_v2  ;;  %v381_v2 = vand.u32 65535, %v282_v25 }
 0x2aa   :  { %v661_v47 = vmul.f32 %v1348_v8, %v594_v9  ;;  %v368_v8 = vshra.s32 %v281_v6, 16 }
 0x2ab   :  { %693 = vperm.xlu1 %919, %v664_v4  }
 0x2ac   :  { %684 = vperm.xlu2 %920, %v661_v47   ;;  %v649_v23 = vpop.permute.xlu0 %648  ;;  %v370_v43 = vcvt.s32.f32 %v368_v8 }
 0x2ce   :  { %725 = vadd.xlane.f32.xlu0 %v724_v16  ;;  %v383_v16 = vcvt.s32.f32 %v381_v2 }
 0x2d6   :  { %361 = vmin.xlane.f32.xlu0 %v1298_v11 }
 0x2df   :  { %v590_v7 = vpop.xlane.xlu2 %589 }
 0x2e0   :  { %v598_v18 = vsub.f32 0.0, %v590_v7 }
 0x2e2   :  { %v665_v41 = vmul.f32 %v649_v23, %v598_v18 }
 0x2e4   :  { %696 = vperm.xlu1 %919, %v665_v41  }
 0x2f6   :  { %v679_v51 = vpop.permute.xlu2 %678 }
 0x2f7   :  { %v699_v49 = vperm.slane %v679_v51, %v1361_v14 }
 0x2fe   :  { %v691_v21 = vpop.permute.xlu2 %690 }
 0x2ff   :  { %v706_v13 = vperm.slane %v691_v21, %v1361_v14 }
 0x306   :  { %v685_v24 = vpop.permute.xlu2 %684 }
 0x307   :  { %v703_v32 = vperm.slane %v685_v24, %v1372_v29 }
 0x308   :  { %v676_v45 = vpop.permute.xlu1 %675 }
 0x309   :  { %v698_v17 = vperm.slane %v676_v45, %v1176_v62 }
 0x30b   :  { %v700_v5 = vsel %vm398_vm5, %v699_v49, %v698_v17 }
 0x30e   :  { %371 = vmin.xlane.f32.xlu1 %v370_v43 }
 0x310   :  { %v688_v11 = vpop.permute.xlu1 %687 }
 0x311   :  { %v705_v20 = vperm.slane %v688_v11, %v1176_v62 }
 0x313   :  { %v707_v63 = vsel %vm398_vm5, %v706_v13, %v705_v20 }
 0x316   :  { %v682_v34 = vpop.permute.xlu0 %681 }
 0x317   :  { %v701_v1 = vperm.slane %v682_v34, %v1369_v3 }
 0x319   :  { %v702_v27 = vsel %vm402_vm6, %v701_v1, %v700_v5 }
 0x31a   :  { %v704_v48 = vsel %vm406_vm7, %v703_v32, %v702_v27 }
 0x31d   :  { %v694_v31 = vpop.permute.xlu1 %693 }
 0x31e   :  { %v708_v12 = vperm.slane %v694_v31, %v1369_v3 }
 0x320   :  { %v709_v46 = vsel %vm402_vm6, %v708_v12, %v707_v63 }
 0x341   :  { %v726_v26 = vpop.xlane.xlu0 %725 }
 0x342   :  { %v727_v10 = vrot.slane %v726_v26, 4 }
 0x344   :  { %v728_v52 = vadd.f32 %v727_v10, %v726_v26 }
 0x346   :  { %v729_v33 = vrot.slane %v728_v52, 2 }
 0x348   :  { %v730_v57 = vadd.f32 %v729_v33, %v728_v52 }
 0x349   :  { %v362_v56 = vpop.xlane.xlu0 %361 }
 0x34a   :  { %v363_v44 = vcvt.f32.s32 %v362_v56  ;;  %v731_v9 = vrot.slane %v730_v57, 1 }
 0x34c   :  { %v366_v36 = vadd.s32 %v365_v54, %v363_v44  ;;  %v732_v23 = vadd.f32 %v731_v9, %v730_v57 }
 0x34e   :  { %v409_v42 = vperm.slane %v366_v36, %v1361_v14 }
 0x350   :  { %v1397_v59 = vsel %vm398_vm5, %v409_v42, %v408_v50 }
 0x356   :  { %v697_v38 = vpop.permute.xlu1 %696 }
 0x357   :  { %v710_v15 = vperm.slane %v697_v38, %v1372_v29 }
 0x359   :  { %v711_v14 = vsel %vm406_vm7, %v710_v15, %v709_v46 }
 0x35a   :  { %v712_v58 = vsel %vm415_vm10, %v711_v14, %v704_v48 }
 0x35b   :  { %v714_v22 = vsel %vm417_vm8, %v712_v58, 0.0 }
 0x35c   :  { %715 = vadd.xlane.f32.xlu2 %v714_v22 }
 0x364   :  { %385 = vmin.xlane.f32.xlu2 %v384_v28 }
 0x381   :  { %v372_v30 = vpop.xlane.xlu1 %371 }
 0x382   :  { %vm373_vm12 = vcmp.eq.f32.partialorder %v370_v43, %v372_v30  ;;  %v378_v26 = vcvt.f32.s32 %v372_v30 }
 0x383   :  { %v374_v55 = vsel %vm373_vm12, %v369_v60, inf }
 0x384   :  { %375 = vmin.xlane.f32.xlu1 %v374_v55  ;;  %v379_v11 = vshll.u32 %v378_v26, 16 }
 0x3cf   :  { %v716_v37 = vpop.xlane.xlu2 %715 }
 0x3d0   :  { %v717_v39 = vrot.slane %v716_v37, 4 }
 0x3d2   :  { %v718_v53 = vadd.f32 %v717_v39, %v716_v37 }
 0x3d4   :  { %v719_v40 = vrot.slane %v718_v53, 2 }
 0x3d6   :  { %v720_v4 = vadd.f32 %v719_v40, %v718_v53 }
 0x3d7   :  { %v386_v47 = vpop.xlane.xlu2 %385 }
 0x3d8   :  { %vm387_vm13 = vcmp.eq.f32.partialorder %v384_v28, %v386_v47  ;;  %v721_v7 = vrot.slane %v720_v4, 1  ;;  %v392_v56 = vcvt.f32.s32 %v386_v47 }
 0x3d9   :  { %v388_v18 = vsel %vm387_vm13, %v383_v16, inf }
 0x3da   :  { %389 = vmin.xlane.f32.xlu2 %v388_v18  ;;  %v722_v41 = vadd.f32 %v721_v7, %v720_v4  ;;  %v393_v44 = vshll.u32 %v392_v56, 16 }
 0x3dc   :  { %896 = vpush %v722_v41 }
 0x3dd   :  { %898 = vpush %v732_v23 }
 0x3f7   :  { %v376_v51 = vpop.xlane.xlu1 %375 }
 0x3f8   :  { %v377_v19 = vcvt.f32.s32 %v376_v51 }
 0x3fa   :  { %v380_v54 = vadd.s32 %v379_v11, %v377_v19 }
 0x3fc   :  { %v411_v62 = vperm.slane %v380_v54, %v1369_v3 }
 0x3fe   :  { %v412_v42 = vsel %vm402_vm6, %v411_v62, %v1397_v59 }
 0x40d   :  { %s897_s6 = spop %896 }
 0x40e   :  { %v735_v6 = vstv %s897_s6  ;;  %s899_s21 = spop %898 }
 0x40f   :  { %v736_v8 = vsel %vm734_vm14, %v735_v6, 0.0  ;;  %v738_v43 = vstv %s899_s21 }
 0x410   :  { %v739_v34 = vsel %vm737_vm15, %v738_v43, 0.0 }
 0x411   :  { %v740_v45 = vadd.f32 %v739_v34, %v736_v8 }
 0x413   :  { %741 = vst [vmem:[%s1445_s8] sm:$0x1] %v740_v45 }
 0x44d   :  { %v390_v21 = vpop.xlane.xlu2 %389 }
 0x44e   :  { %v391_v36 = vcvt.f32.s32 %v390_v21 }
 0x450   :  { %v394_v50 = vadd.s32 %v393_v44, %v391_v36 }
 0x452   :  { %v413_v31 = vperm.slane %v394_v50, %v1372_v29 }
 0x454   :  { %v414_v17 = vsel %vm406_vm7, %v413_v31, %v412_v42 }
 0x455   :  { %v416_v1 = vsel %vm415_vm10, %v414_v17, %v1379_v0 }
 0x456   :  { %418 = vst.msk [vmem:[#allocation4] sm:$0x3] %vm417_vm8, %v416_v1 }
 0x457   :  { %765 = dma.vmem_to_hbm [thread:$0]  %s761_s25, 32, %s763_s28, [#allocation5]  }
 0x458   :  { %1003 = dma.done.wait [#allocation3], 1024  }
 0x459   :  { %1004 = vsyncadd [#allocation3], 4294966272 }
 0x45a   :  { %1005 = dma.done.wait [#allocation5], 32  }
 0x45b   :  { %1006 = vsyncadd [#allocation5], 4294967264 }
 0x45c   :  { %778 = vsyncpa [#allocation3], 1 }
 0x45d   :  { %779 = vsyncpa [#allocation5], 1 }

</bundles_post_ra>
